<compile_context>
chip_gen: v5e
topology: v5e:2x2
jax: 0.10.0
libtpu: 0.0.40
codegen_flags: <defaults>
</compile_context>

<pallas_src>
import functools
import math

import jax
import jax.numpy as jnp
from jax import lax
from jax.experimental import pallas as pl
from jax.experimental.pallas import tpu as pltpu


def _conv3x3_relu_kernel(xc_ref, xp_ref, xn_ref, w_ref, b_ref, out_ref, *,
                         C, W, TH):
    """3x3 same-conv + bias + ReLU for one (batch, row-tile) grid point.

    xc_ref  : (1, C, P)     current row tile, pixels flattened (P = TH*W)
    xp_ref  : (1, C, P)     previous row tile (clamped) -> top halo row
    xn_ref  : (1, C, P)     next row tile (clamped)     -> bottom halo row
    w_ref   : (Cout, 9*C)   conv weights, tap-major (ky, kx, cin)
    b_ref   : (Cout, 1)     conv bias
    out_ref : (1, Cout, P)  conv+ReLU output, lane-dense flat pixels
    """
    P = TH * W
    t = pl.program_id(1)
    n_tiles = pl.num_programs(1)

    xc = xc_ref[0]                                   # (C, P)
    xp = xp_ref[0]
    xn = xn_ref[0]

    lane = lax.broadcasted_iota(jnp.int32, (1, P), 1)
    col = lane % W                                   # column index of each lane

    # Build the (9*C, P) im2col block with lane rolls + border masks.
    parts = []
    for ky in range(3):
        for kx in range(3):
            d = (ky - 1) * W + (kx - 1)              # flat pixel offset of tap
            shift = (-d) % P
            rc = pltpu.roll(xc, shift, axis=1) if shift else xc
            if ky == 0:
                # lanes whose source row lies above this tile: take them from
                # the previous tile (same roll), zero at the top of the image.
                halo = lane + d < 0
                rp = pltpu.roll(xp, shift, axis=1)
                top = jnp.where(t > 0, rp, jnp.zeros_like(rp))
                val = jnp.where(halo, top, rc)
            elif ky == 2:
                halo = lane + d >= P
                rn = pltpu.roll(xn, shift, axis=1)
                bot = jnp.where(t < n_tiles - 1, rn, jnp.zeros_like(rn))
                val = jnp.where(halo, bot, rc)
            else:
                val = rc
            # zero padding along W: mask columns that fell off the image edge.
            if kx == 0:
                val = jnp.where(col != 0, val, jnp.zeros_like(val))
            elif kx == 2:
                val = jnp.where(col != W - 1, val, jnp.zeros_like(val))
            parts.append(val)

    im2col = jnp.concatenate(parts, axis=0)          # (9*C, P)

    # One fused MXU matmul (K = 9*C) with f32 accumulation, then bias + ReLU.
    acc = jnp.dot(w_ref[...], im2col, preferred_element_type=jnp.float32)
    acc = jnp.maximum(acc + b_ref[...], 0.0)         # (Cout, P), lane-dense
    out_ref[0] = acc.astype(out_ref.dtype)


def _choose_row_tile(H, W, C, itemsize, vmem_budget_bytes=8 * 1024 * 1024):
    """Largest row tile TH that divides H, keeps the lane dim a multiple of 128
    (unless the tile is the whole image) and fits a double-buffered grid step
    in a conservative VMEM budget (safe for v5e/v6e/v7x)."""
    legal = [d for d in range(1, H + 1)
             if H % d == 0 and (d == H or (d * W) % 128 == 0)]
    for TH in sorted(legal, reverse=True):
        P = TH * W
        est = (3 * C + 4 * C) * P * itemsize * 2 + (9 * C + 4 * C) * P * 4
        if est <= vmem_budget_bytes:
            return TH
    return min(legal)


def conv3x3_relu_nchw(x, w_pt, b, *, row_tile=None, compute_dtype=None):
    """Conv2d(C, 4*C, 3, 1, 1) + ReLU on NCHW input via the Pallas kernel.

    x: (N, C, H, W), w_pt: (Cout, C, 3, 3) PyTorch layout, b: (Cout,).
    Returns (N, Cout, H, W) in x.dtype.
    """
    N, C, H, W = x.shape
    Cout = w_pt.shape[0]
    cdtype = jnp.dtype(compute_dtype) if compute_dtype is not None else x.dtype

    TH = row_tile if row_tile is not None else _choose_row_tile(
        H, W, C, jnp.dtype(cdtype).itemsize)
    assert H % TH == 0 and (TH == H or (TH * W) % 128 == 0), (
        f"row tile {TH} incompatible with H={H}, W={W}")
    nH = H // TH
    P = TH * W

    # One-time, contiguous (free) layout prep in the wrapper; constant
    # index_maps below keep weights/bias VMEM-resident for the whole grid.
    wmat = jnp.transpose(w_pt, (0, 2, 3, 1)).reshape(Cout, 9 * C).astype(cdtype)
    b2 = b.reshape(Cout, 1).astype(jnp.float32)
    x_flat = x.reshape(N, C, H * W).astype(cdtype)

    kernel = functools.partial(_conv3x3_relu_kernel, C=C, W=W, TH=TH)

    y_flat = pl.pallas_call(
        kernel,
        out_shape=jax.ShapeDtypeStruct((N, Cout, H * W), x.dtype),
        grid_spec=pltpu.PrefetchScalarGridSpec(
            num_scalar_prefetch=0,
            grid=(N, nH),
            in_specs=[
                pl.BlockSpec((1, C, P), lambda n, t: (n, 0, t)),
                pl.BlockSpec((1, C, P),
                             lambda n, t: (n, 0, jnp.maximum(t - 1, 0))),
                pl.BlockSpec((1, C, P),
                             lambda n, t: (n, 0, jnp.minimum(t + 1, nH - 1))),
                pl.BlockSpec((Cout, 9 * C), lambda n, t: (0, 0)),
                pl.BlockSpec((Cout, 1), lambda n, t: (0, 0)),
            ],
            out_specs=pl.BlockSpec((1, Cout, P), lambda n, t: (n, 0, t)),
        ),
        compiler_params=pltpu.CompilerParams(
            dimension_semantics=("parallel", "parallel"),
            vmem_limit_bytes=48 * 1024 * 1024,
        ),
    )(x_flat, x_flat, x_flat, wmat, b2)

    return y_flat.reshape(N, Cout, H, W)              # contiguous (free) reshape


def pixel_shuffle_nchw(x, r):
    """torch.nn.PixelShuffle(r) on an NCHW tensor (layout glue, one XLA pass)."""
    N, Cr2, H, W = x.shape
    C = Cr2 // (r * r)
    x = x.reshape(N, C, r, r, H, W)
    x = x.transpose(0, 1, 4, 2, 5, 3)                 # N, C, H, r, W, r
    return x.reshape(N, C, H * r, W * r)


@functools.partial(jax.jit, static_argnames=("scale", "row_tile", "compute_dtype"))
def upsample_block_forward(x, params, scale=2, *, row_tile=None,
                           compute_dtype=None):
    """UpsampleBlock(multi_scale=False).forward(x, scale) for scale in {2,4,8}."""
    del scale  # multi_scale=False: the module applies its single branch regardless
    out = x
    for (w_pt, b) in params:   # one (conv3x3 -> ReLU -> PixelShuffle(2)) stage
        y = conv3x3_relu_nchw(out, w_pt, b, row_tile=row_tile,
                              compute_dtype=compute_dtype)
        out = pixel_shuffle_nchw(y, 2)
    return out


def make_params(key, n_channels, scale):
    """PyTorch-default Conv2d init; one (C -> 4*C, 3x3) stage per factor of 2."""
    assert scale in (2, 4, 8)
    params = []
    for _ in range(int(round(math.log2(scale)))):
        key, kw, kb = jax.random.split(key, 3)
        cin, cout = n_channels, 4 * n_channels
        bound = 1.0 / ((cin * 9) ** 0.5)
        w = jax.random.uniform(kw, (cout, cin, 3, 3), jnp.float32, -bound, bound)
        b = jax.random.uniform(kb, (cout,), jnp.float32, -bound, bound)
        params.append((w, b))
    return params


def _reference_forward(x, params):
    """Pure-JAX/XLA reference used only for the numerical self-check."""
    out = x
    for (w_pt, b) in params:
        y = lax.conv_general_dilated(
            out, w_pt, window_strides=(1, 1), padding=((1, 1), (1, 1)),
            dimension_numbers=("NCHW", "OIHW", "NCHW"))
        y = jnp.maximum(y + b[None, :, None, None], 0.0)
        out = pixel_shuffle_nchw(y, 2)
    return out


if __name__ == "__main__":
    key = jax.random.PRNGKey(0)
    k_x, k_p = jax.random.split(key)

    N, C, H, W = 2, 4, 16, 16
    x = jax.random.normal(k_x, (N, C, H, W), jnp.float32)    # NCHW like PyTorch
    params = make_params(k_p, n_channels=C, scale=2)

    # Forced 8-row tiles (exercises the multi-tile halo path) + auto-tiled path.
    y_tiled = upsample_block_forward(x, params, scale=2, row_tile=8)
    y_auto = upsample_block_forward(x, params, scale=2)
    y_tiled, y_auto = jax.block_until_ready((y_tiled, y_auto))

    y_ref = _reference_forward(x, params)

    assert y_auto.shape == (N, C, 2 * H, 2 * W), y_auto.shape
    assert y_tiled.shape == (N, C, 2 * H, 2 * W), y_tiled.shape
    assert bool(jnp.all(jnp.isfinite(y_auto)))
    assert bool(jnp.all(jnp.isfinite(y_tiled)))
    assert bool(jnp.allclose(y_tiled, y_ref, rtol=2e-2, atol=2e-2))
    assert bool(jnp.allclose(y_auto, y_ref, rtol=2e-2, atol=2e-2))
    print("KERNEL_OK")
</pallas_src>

<mosaic_0001>
module attributes {stable_mosaic.version = 11 : i64} {
  func.func @_conv3x3_relu_kernel(%arg0: i32, %arg1: i32, %arg2: memref<1x4x128xf32, #tpu.memory_space<vmem>>, %arg3: memref<1x4x128xf32, #tpu.memory_space<vmem>>, %arg4: memref<1x4x128xf32, #tpu.memory_space<vmem>>, %arg5: memref<16x36xf32, #tpu.memory_space<vmem>>, %arg6: memref<16x1xf32, #tpu.memory_space<vmem>>, %arg7: memref<1x16x128xf32, #tpu.memory_space<vmem>>) attributes {dimension_semantics = [#tpu.dimension_semantics<parallel>, #tpu.dimension_semantics<parallel>], iteration_bounds = array<i64: 2, 2>, scalar_prefetch = 0 : i64, scratch_operands = 0 : i64, tpu.core_type = #tpu.core_type<tc>, window_params = [{transform_indices = @transform_0, window_bounds = array<i64: 1, 4, 128>}, {transform_indices = @transform_1, window_bounds = array<i64: 1, 4, 128>}, {transform_indices = @transform_2, window_bounds = array<i64: 1, 4, 128>}, {pipeline_mode = #tpu.pipeline_mode<synchronous>, transform_indices = @transform_3, window_bounds = array<i64: 16, 36>}, {pipeline_mode = #tpu.pipeline_mode<synchronous>, transform_indices = @transform_4, window_bounds = array<i64: 16, 1>}, {transform_indices = @transform_5, window_bounds = array<i64: 1, 16, 128>}]} {
    %c0 = arith.constant 0 : index
    %c0_0 = arith.constant 0 : index
    %c0_1 = arith.constant 0 : index
    %0 = vector.load %arg2[%c0, %c0_0, %c0_1] : memref<1x4x128xf32, #tpu.memory_space<vmem>>, vector<1x4x128xf32>
    %1 = vector.shape_cast %0 : vector<1x4x128xf32> to vector<4x128xf32>
    %c0_2 = arith.constant 0 : index
    %c0_3 = arith.constant 0 : index
    %c0_4 = arith.constant 0 : index
    %2 = vector.load %arg3[%c0_2, %c0_3, %c0_4] : memref<1x4x128xf32, #tpu.memory_space<vmem>>, vector<1x4x128xf32>
    %3 = vector.shape_cast %2 : vector<1x4x128xf32> to vector<4x128xf32>
    %c0_5 = arith.constant 0 : index
    %c0_6 = arith.constant 0 : index
    %c0_7 = arith.constant 0 : index
    %4 = vector.load %arg4[%c0_5, %c0_6, %c0_7] : memref<1x4x128xf32, #tpu.memory_space<vmem>>, vector<1x4x128xf32>
    %5 = vector.shape_cast %4 : vector<1x4x128xf32> to vector<4x128xf32>
    %6 = tpu.iota {dimensions = array<i32: 1>} : vector<1x128xi32>
    %c16_i32 = arith.constant 16 : i32
    %c0_i32 = arith.constant 0 : i32
    %7 = arith.cmpi eq, %c16_i32, %c0_i32 : i32
    %c1_i32 = arith.constant 1 : i32
    %8 = arith.select %7, %c1_i32, %c16_i32 : i32
    %9 = vector.broadcast %8 : i32 to vector<1x128xi32>
    %10 = arith.remsi %6, %9 : vector<1x128xi32>
    %c0_i32_8 = arith.constant 0 : i32
    %11 = vector.broadcast %c0_i32_8 : i32 to vector<1x128xi32>
    %12 = arith.cmpi ne, %10, %11 : vector<1x128xi32>
    %c0_i32_9 = arith.constant 0 : i32
    %13 = vector.broadcast %c0_i32_9 : i32 to vector<1x128xi32>
    %14 = arith.cmpi slt, %10, %13 : vector<1x128xi32>
    %c0_i32_10 = arith.constant 0 : i32
    %15 = arith.cmpi slt, %8, %c0_i32_10 : i32
    %16 = vector.broadcast %15 : i1 to vector<1x128xi1>
    %17 = vector.broadcast %16 : vector<1x128xi1> to vector<1x128xi1>
    %18 = arith.xori %14, %17 : vector<1x128xi1>
    %19 = arith.andi %18, %12 : vector<1x128xi1>
    %20 = vector.broadcast %8 : i32 to vector<1x128xi32>
    %21 = arith.addi %10, %20 : vector<1x128xi32>
    %22 = arith.select %19, %21, %10 : vector<1x128xi1>, vector<1x128xi32>
    %c17_i32 = arith.constant 17 : i32
    %23 = tpu.dynamic_rotate %1 by %c17_i32 dim 1 : vector<4x128xf32>, i32 -> vector<4x128xf32>
    %c-17_i32 = arith.constant -17 : i32
    %24 = vector.broadcast %c-17_i32 : i32 to vector<1x128xi32>
    %25 = arith.addi %6, %24 : vector<1x128xi32>
    %c0_i32_11 = arith.constant 0 : i32
    %26 = vector.broadcast %c0_i32_11 : i32 to vector<1x128xi32>
    %27 = arith.cmpi slt, %25, %26 : vector<1x128xi32>
    %c17_i32_12 = arith.constant 17 : i32
    %28 = tpu.dynamic_rotate %3 by %c17_i32_12 dim 1 : vector<4x128xf32>, i32 -> vector<4x128xf32>
    %c0_i32_13 = arith.constant 0 : i32
    %29 = arith.cmpi sgt, %arg1, %c0_i32_13 : i32
    %cst = arith.constant 0.000000e+00 : f32
    %30 = vector.broadcast %cst : f32 to vector<4x128xf32>
    %31 = arith.select %29, %28, %30 : vector<4x128xf32>
    %32 = vector.shape_cast %27 : vector<1x128xi1> to vector<1x128xi1>
    %33 = vector.broadcast %32 : vector<1x128xi1> to vector<4x128xi1>
    %34 = arith.select %33, %31, %23 : vector<4x128xi1>, vector<4x128xf32>
    %c0_i32_14 = arith.constant 0 : i32
    %35 = vector.broadcast %c0_i32_14 : i32 to vector<1x128xi32>
    %36 = arith.cmpi ne, %22, %35 : vector<1x128xi32>
    %cst_15 = arith.constant 0.000000e+00 : f32
    %37 = vector.broadcast %cst_15 : f32 to vector<4x128xf32>
    %38 = vector.shape_cast %36 : vector<1x128xi1> to vector<1x128xi1>
    %39 = vector.broadcast %38 : vector<1x128xi1> to vector<4x128xi1>
    %40 = arith.select %39, %34, %37 : vector<4x128xi1>, vector<4x128xf32>
    %c16_i32_16 = arith.constant 16 : i32
    %41 = tpu.dynamic_rotate %1 by %c16_i32_16 dim 1 : vector<4x128xf32>, i32 -> vector<4x128xf32>
    %c-16_i32 = arith.constant -16 : i32
    %42 = vector.broadcast %c-16_i32 : i32 to vector<1x128xi32>
    %43 = arith.addi %6, %42 : vector<1x128xi32>
    %c0_i32_17 = arith.constant 0 : i32
    %44 = vector.broadcast %c0_i32_17 : i32 to vector<1x128xi32>
    %45 = arith.cmpi slt, %43, %44 : vector<1x128xi32>
    %c16_i32_18 = arith.constant 16 : i32
    %46 = tpu.dynamic_rotate %3 by %c16_i32_18 dim 1 : vector<4x128xf32>, i32 -> vector<4x128xf32>
    %c0_i32_19 = arith.constant 0 : i32
    %47 = arith.cmpi sgt, %arg1, %c0_i32_19 : i32
    %cst_20 = arith.constant 0.000000e+00 : f32
    %48 = vector.broadcast %cst_20 : f32 to vector<4x128xf32>
    %49 = arith.select %47, %46, %48 : vector<4x128xf32>
    %50 = vector.shape_cast %45 : vector<1x128xi1> to vector<1x128xi1>
    %51 = vector.broadcast %50 : vector<1x128xi1> to vector<4x128xi1>
    %52 = arith.select %51, %49, %41 : vector<4x128xi1>, vector<4x128xf32>
    %c15_i32 = arith.constant 15 : i32
    %53 = tpu.dynamic_rotate %1 by %c15_i32 dim 1 : vector<4x128xf32>, i32 -> vector<4x128xf32>
    %c-15_i32 = arith.constant -15 : i32
    %54 = vector.broadcast %c-15_i32 : i32 to vector<1x128xi32>
    %55 = arith.addi %6, %54 : vector<1x128xi32>
    %c0_i32_21 = arith.constant 0 : i32
    %56 = vector.broadcast %c0_i32_21 : i32 to vector<1x128xi32>
    %57 = arith.cmpi slt, %55, %56 : vector<1x128xi32>
    %c15_i32_22 = arith.constant 15 : i32
    %58 = tpu.dynamic_rotate %3 by %c15_i32_22 dim 1 : vector<4x128xf32>, i32 -> vector<4x128xf32>
    %c0_i32_23 = arith.constant 0 : i32
    %59 = arith.cmpi sgt, %arg1, %c0_i32_23 : i32
    %cst_24 = arith.constant 0.000000e+00 : f32
    %60 = vector.broadcast %cst_24 : f32 to vector<4x128xf32>
    %61 = arith.select %59, %58, %60 : vector<4x128xf32>
    %62 = vector.shape_cast %57 : vector<1x128xi1> to vector<1x128xi1>
    %63 = vector.broadcast %62 : vector<1x128xi1> to vector<4x128xi1>
    %64 = arith.select %63, %61, %53 : vector<4x128xi1>, vector<4x128xf32>
    %c15_i32_25 = arith.constant 15 : i32
    %65 = vector.broadcast %c15_i32_25 : i32 to vector<1x128xi32>
    %66 = arith.cmpi ne, %22, %65 : vector<1x128xi32>
    %cst_26 = arith.constant 0.000000e+00 : f32
    %67 = vector.broadcast %cst_26 : f32 to vector<4x128xf32>
    %68 = vector.shape_cast %66 : vector<1x128xi1> to vector<1x128xi1>
    %69 = vector.broadcast %68 : vector<1x128xi1> to vector<4x128xi1>
    %70 = arith.select %69, %64, %67 : vector<4x128xi1>, vector<4x128xf32>
    %c1_i32_27 = arith.constant 1 : i32
    %71 = tpu.dynamic_rotate %1 by %c1_i32_27 dim 1 : vector<4x128xf32>, i32 -> vector<4x128xf32>
    %c0_i32_28 = arith.constant 0 : i32
    %72 = vector.broadcast %c0_i32_28 : i32 to vector<1x128xi32>
    %73 = arith.cmpi ne, %22, %72 : vector<1x128xi32>
    %cst_29 = arith.constant 0.000000e+00 : f32
    %74 = vector.broadcast %cst_29 : f32 to vector<4x128xf32>
    %75 = vector.shape_cast %73 : vector<1x128xi1> to vector<1x128xi1>
    %76 = vector.broadcast %75 : vector<1x128xi1> to vector<4x128xi1>
    %77 = arith.select %76, %71, %74 : vector<4x128xi1>, vector<4x128xf32>
    %c127_i32 = arith.constant 127 : i32
    %78 = tpu.dynamic_rotate %1 by %c127_i32 dim 1 : vector<4x128xf32>, i32 -> vector<4x128xf32>
    %c15_i32_30 = arith.constant 15 : i32
    %79 = vector.broadcast %c15_i32_30 : i32 to vector<1x128xi32>
    %80 = arith.cmpi ne, %22, %79 : vector<1x128xi32>
    %cst_31 = arith.constant 0.000000e+00 : f32
    %81 = vector.broadcast %cst_31 : f32 to vector<4x128xf32>
    %82 = vector.shape_cast %80 : vector<1x128xi1> to vector<1x128xi1>
    %83 = vector.broadcast %82 : vector<1x128xi1> to vector<4x128xi1>
    %84 = arith.select %83, %78, %81 : vector<4x128xi1>, vector<4x128xf32>
    %c113_i32 = arith.constant 113 : i32
    %85 = tpu.dynamic_rotate %1 by %c113_i32 dim 1 : vector<4x128xf32>, i32 -> vector<4x128xf32>
    %c15_i32_32 = arith.constant 15 : i32
    %86 = vector.broadcast %c15_i32_32 : i32 to vector<1x128xi32>
    %87 = arith.addi %6, %86 : vector<1x128xi32>
    %c128_i32 = arith.constant 128 : i32
    %88 = vector.broadcast %c128_i32 : i32 to vector<1x128xi32>
    %89 = arith.cmpi sge, %87, %88 : vector<1x128xi32>
    %c113_i32_33 = arith.constant 113 : i32
    %90 = tpu.dynamic_rotate %5 by %c113_i32_33 dim 1 : vector<4x128xf32>, i32 -> vector<4x128xf32>
    %c1_i32_34 = arith.constant 1 : i32
    %91 = arith.cmpi slt, %arg1, %c1_i32_34 : i32
    %cst_35 = arith.constant 0.000000e+00 : f32
    %92 = vector.broadcast %cst_35 : f32 to vector<4x128xf32>
    %93 = arith.select %91, %90, %92 : vector<4x128xf32>
    %94 = vector.shape_cast %89 : vector<1x128xi1> to vector<1x128xi1>
    %95 = vector.broadcast %94 : vector<1x128xi1> to vector<4x128xi1>
    %96 = arith.select %95, %93, %85 : vector<4x128xi1>, vector<4x128xf32>
    %c0_i32_36 = arith.constant 0 : i32
    %97 = vector.broadcast %c0_i32_36 : i32 to vector<1x128xi32>
    %98 = arith.cmpi ne, %22, %97 : vector<1x128xi32>
    %cst_37 = arith.constant 0.000000e+00 : f32
    %99 = vector.broadcast %cst_37 : f32 to vector<4x128xf32>
    %100 = vector.shape_cast %98 : vector<1x128xi1> to vector<1x128xi1>
    %101 = vector.broadcast %100 : vector<1x128xi1> to vector<4x128xi1>
    %102 = arith.select %101, %96, %99 : vector<4x128xi1>, vector<4x128xf32>
    %c112_i32 = arith.constant 112 : i32
    %103 = tpu.dynamic_rotate %1 by %c112_i32 dim 1 : vector<4x128xf32>, i32 -> vector<4x128xf32>
    %c16_i32_38 = arith.constant 16 : i32
    %104 = vector.broadcast %c16_i32_38 : i32 to vector<1x128xi32>
    %105 = arith.addi %6, %104 : vector<1x128xi32>
    %c128_i32_39 = arith.constant 128 : i32
    %106 = vector.broadcast %c128_i32_39 : i32 to vector<1x128xi32>
    %107 = arith.cmpi sge, %105, %106 : vector<1x128xi32>
    %c112_i32_40 = arith.constant 112 : i32
    %108 = tpu.dynamic_rotate %5 by %c112_i32_40 dim 1 : vector<4x128xf32>, i32 -> vector<4x128xf32>
    %c1_i32_41 = arith.constant 1 : i32
    %109 = arith.cmpi slt, %arg1, %c1_i32_41 : i32
    %cst_42 = arith.constant 0.000000e+00 : f32
    %110 = vector.broadcast %cst_42 : f32 to vector<4x128xf32>
    %111 = arith.select %109, %108, %110 : vector<4x128xf32>
    %112 = vector.shape_cast %107 : vector<1x128xi1> to vector<1x128xi1>
    %113 = vector.broadcast %112 : vector<1x128xi1> to vector<4x128xi1>
    %114 = arith.select %113, %111, %103 : vector<4x128xi1>, vector<4x128xf32>
    %c111_i32 = arith.constant 111 : i32
    %115 = tpu.dynamic_rotate %1 by %c111_i32 dim 1 : vector<4x128xf32>, i32 -> vector<4x128xf32>
    %c17_i32_43 = arith.constant 17 : i32
    %116 = vector.broadcast %c17_i32_43 : i32 to vector<1x128xi32>
    %117 = arith.addi %6, %116 : vector<1x128xi32>
    %c128_i32_44 = arith.constant 128 : i32
    %118 = vector.broadcast %c128_i32_44 : i32 to vector<1x128xi32>
    %119 = arith.cmpi sge, %117, %118 : vector<1x128xi32>
    %c111_i32_45 = arith.constant 111 : i32
    %120 = tpu.dynamic_rotate %5 by %c111_i32_45 dim 1 : vector<4x128xf32>, i32 -> vector<4x128xf32>
    %c1_i32_46 = arith.constant 1 : i32
    %121 = arith.cmpi slt, %arg1, %c1_i32_46 : i32
    %cst_47 = arith.constant 0.000000e+00 : f32
    %122 = vector.broadcast %cst_47 : f32 to vector<4x128xf32>
    %123 = arith.select %121, %120, %122 : vector<4x128xf32>
    %124 = vector.shape_cast %119 : vector<1x128xi1> to vector<1x128xi1>
    %125 = vector.broadcast %124 : vector<1x128xi1> to vector<4x128xi1>
    %126 = arith.select %125, %123, %115 : vector<4x128xi1>, vector<4x128xf32>
    %c15_i32_48 = arith.constant 15 : i32
    %127 = vector.broadcast %c15_i32_48 : i32 to vector<1x128xi32>
    %128 = arith.cmpi ne, %22, %127 : vector<1x128xi32>
    %cst_49 = arith.constant 0.000000e+00 : f32
    %129 = vector.broadcast %cst_49 : f32 to vector<4x128xf32>
    %130 = vector.shape_cast %128 : vector<1x128xi1> to vector<1x128xi1>
    %131 = vector.broadcast %130 : vector<1x128xi1> to vector<4x128xi1>
    %132 = arith.select %131, %126, %129 : vector<4x128xi1>, vector<4x128xf32>
    %133 = tpu.concatenate %40, %52, %70, %77, %1, %84, %102, %114, %132 in 0 : vector<4x128xf32>, vector<4x128xf32>, vector<4x128xf32>, vector<4x128xf32>, vector<4x128xf32>, vector<4x128xf32>, vector<4x128xf32>, vector<4x128xf32>, vector<4x128xf32> -> vector<36x128xf32>
    %c0_50 = arith.constant 0 : index
    %c0_51 = arith.constant 0 : index
    %134 = vector.load %arg5[%c0_50, %c0_51] : memref<16x36xf32, #tpu.memory_space<vmem>>, vector<16x36xf32>
    %cst_52 = arith.constant dense<0.000000e+00> : vector<16x128xf32>
    %135 = tpu.matmul %134, %133, %cst_52 {dimension_numbers = #tpu.dot_dimension_numbers<[1], [0], [0], [1], [0, 0, 1, 1], [], []>} : vector<16x36xf32>, vector<36x128xf32>, vector<16x128xf32> -> vector<16x128xf32>
    %c0_53 = arith.constant 0 : index
    %c0_54 = arith.constant 0 : index
    %136 = vector.load %arg6[%c0_53, %c0_54] : memref<16x1xf32, #tpu.memory_space<vmem>>, vector<16x1xf32>
    %137 = vector.broadcast %136 : vector<16x1xf32> to vector<16x128xf32>
    %138 = arith.addf %135, %137 : vector<16x128xf32>
    %cst_55 = arith.constant 0.000000e+00 : f32
    %139 = vector.broadcast %cst_55 : f32 to vector<16x128xf32>
    %140 = arith.maximumf %138, %139 : vector<16x128xf32>
    %c0_56 = arith.constant 0 : index
    %c0_57 = arith.constant 0 : index
    %c0_58 = arith.constant 0 : index
    %141 = vector.load %arg7[%c0_56, %c0_57, %c0_58] : memref<1x16x128xf32, #tpu.memory_space<vmem>>, vector<1x16x128xf32>
    %142 = vector.shape_cast %141 : vector<1x16x128xf32> to vector<16x128xf32>
    %143 = vector.shape_cast %140 : vector<16x128xf32> to vector<1x16x128xf32>
    tpu.vector_store %arg7[%c0_56, %c0_57, %c0_58], %143 {strides = array<i32>} : memref<1x16x128xf32, #tpu.memory_space<vmem>>, vector<1x16x128xf32>,
    return
  }
  func.func @transform_0(%arg0: i32, %arg1: i32) -> (i32, i32, i32) {
    %c0_i32 = arith.constant 0 : i32
    %c0_i32_0 = arith.constant 0 : i32
    return %arg0, %c0_i32, %arg1 : i32, i32, i32
  }
  func.func @transform_1(%arg0: i32, %arg1: i32) -> (i32, i32, i32) {
    %c1_i32 = arith.constant 1 : i32
    %0 = arith.subi %arg1, %c1_i32 : i32
    %c0_i32 = arith.constant 0 : i32
    %1 = arith.maxsi %0, %c0_i32 : i32
    %c0_i32_0 = arith.constant 0 : i32
    %c0_i32_1 = arith.constant 0 : i32
    return %arg0, %c0_i32_0, %1 : i32, i32, i32
  }
  func.func @transform_2(%arg0: i32, %arg1: i32) -> (i32, i32, i32) {
    %c1_i32 = arith.constant 1 : i32
    %0 = arith.addi %arg1, %c1_i32 : i32
    %c1_i32_0 = arith.constant 1 : i32
    %1 = arith.minsi %0, %c1_i32_0 : i32
    %c0_i32 = arith.constant 0 : i32
    %c0_i32_1 = arith.constant 0 : i32
    return %arg0, %c0_i32, %1 : i32, i32, i32
  }
  func.func @transform_3(%arg0: i32, %arg1: i32) -> (i32, i32) {
    %c0_i32 = arith.constant 0 : i32
    %c0_i32_0 = arith.constant 0 : i32
    %c0_i32_1 = arith.constant 0 : i32
    return %c0_i32, %c0_i32_0 : i32, i32
  }
  func.func @transform_4(%arg0: i32, %arg1: i32) -> (i32, i32) {
    %c0_i32 = arith.constant 0 : i32
    %c0_i32_0 = arith.constant 0 : i32
    %c0_i32_1 = arith.constant 0 : i32
    return %c0_i32, %c0_i32_0 : i32, i32
  }
  func.func @transform_5(%arg0: i32, %arg1: i32) -> (i32, i32, i32) {
    %c0_i32 = arith.constant 0 : i32
    %c0_i32_0 = arith.constant 0 : i32
    return %arg0, %c0_i32, %arg1 : i32, i32, i32
  }
}

</mosaic_0001>

<bundles_post_ra>
// kernel: upsample_block_forward.1
= control target key start
LH: loop header
LB: loop body
LE: loop exit
PB: predicated region body
PF: predicated region fallthrough
CT: control target
= control target key end

     0   :  { %s1074_s0 = inlined_call_operand.vmem [shape: f32[2,4,256], index: 0, kind: input, shape index: {}, may-alias: {0,1,2}]   ;;  %s1075_s1 = inlined_call_operand.vmem [shape: f32[2,4,256], index: 1, kind: input, shape index: {}, may-alias: {0,1,2}]   ;;  %s1076_s2 = inlined_call_operand.vmem [shape: f32[2,4,256], index: 2, kind: input, shape index: {}, may-alias: {0,1,2}]   ;;  %s1077_s3 = inlined_call_operand.vmem [shape: f32[16,36], index: 3, kind: input, shape index: {}]   ;;  %s1078_s4 = inlined_call_operand.vmem [shape: f32[16,1], index: 4, kind: input, shape index: {}]   ;;  %s1079_s5 = inlined_call_operand.vmem [shape: f32[2,16,256], index: 5, kind: output, shape index: {}]  }
   0x1   :  { %1080 = sst [smem:[#allocation3_spill]] %s1074_s0 }
   0x2   :  { %s896_s18 = smov 0   ;;  %s898_s19 = smov 0  }
   0x3   :  { %s900_s20 = smov 0   ;;  %s902_s21 = smov 0  }
   0x4   :  { %s904_s22 = smov 0   ;;  %s906_s23 = smov 0  }
   0x5   :  { %s908_s24 = smov 0  }
   0x6 LB: > { %s24_s25 = sadd.s32 1, %s847_s22  ;;  %s27_s26 = sadd.s32 1, %s851_s23  ;;  %s855_s24 = sphi %s908_s24, %s15_s24   ;;  %s851_s23 = sphi %s906_s23, %s1096_s23   ;;  %s847_s22 = sphi %s904_s22, %s1095_s22   ;;  %s843_s21 = sphi %s902_s21, %s1094_s21   ;;  %s839_s20 = sphi %s900_s20, %s1093_s20   ;;  %s835_s19 = sphi %s898_s19, %s1092_s19   ;;  %s831_s18 = sphi %s896_s18, %s1091_s18  }
   0x7   : > { %p25_p0 = scmp.ge.s32.totalorder %s24_s25, 2  ;;  %s671_s27 = sadd.s32 4294967295, %s855_s24  }
   0x8   : > { %p184_p1 = scmp.ne.s32.totalorder %s835_s19, %s831_s18  ;;  %p185_p2 = scmp.eq.s32.totalorder %s671_s27, 3 }
   0x9   : > { %s1098_s25 = smov (%p25_p0, %s24_s25), 0  ;;  %s1100_s26 = smov (!%p25_p0, %s27_s26), %s851_s23 }
   0xa   : > { %s170_s28 = ssub.s32 %s847_s22, %s1098_s25  ;;  %p29_p3 = scmp.ge.s32.totalorder %s1100_s26, 2 }
   0xb   : > { %p677_p4 = scmp.ge.s32.totalorder %s855_s24, 1  ;;  %p942_p5 = por %p185_p2, %p184_p1 }
   0xc   : > { %p260_p6 = scmp.lt.s32.totalorder %s855_s24, 5  ;;  %s1102_s26 = smov (%p29_p3, %s1100_s26), 0 }
   0xd   : > { %s169_s30 = ssub.s32 %s851_s23, %s1102_s26  ;;  %s174_s7 = sadd.s32 1, %s835_s19 }
   0xe   : > { %p261_p7 = pnand %p677_p4, %p260_p6  ;;  %s171_s6 = sor.u32 %s170_s28, %s169_s30 }
   0xf   : > { %p172_p8 = scmp.eq.s32.totalorder %s171_s6, 0  ;;  %p312_p9 = scmp.lt.s32.totalorder (!%p261_p7), %s843_s21, 1 }
  0x10   : > { %264 = sbr.rel (%p261_p7) target bundleno = 311 (0x137), region = 40  ;;  %p314_p10 = scmp.lt.s32.totalorder (!%p261_p7), %s839_s20, 1 }
  0x11   : > { %s953_s8 = scalar_select %p172_p8, %s835_s19, %s174_s7  }
  0x12   : > { %s334_s9 = sadd.s32 (!%p261_p7), 1, %s839_s20  ;;  %s1082_s0 = sld [smem:[#allocation3_spill]] (!%p261_p7) }
  0x13   : > { %p335_p11 = scmp.lt.s32.totalorder (!%p261_p7), %s334_s9, 1  ;;  %s681_s27 = sadd.s32 (!%p261_p7), 4294967295, %s839_s20 }
  0x14   : > { %s857_s28 = smov (!%p261_p7), 111   ;;  %p321_p12 = scmp.gt.s32.totalorder (!%p261_p7), %s681_s27, 0 }
  0x15   : > { %s313_s10 = scalar_select %p312_p9, %s843_s21, 1  ;;  %v351_v6 = vlaneseq  ;;  %v468_v8 = vld [vmem:[%s1078_s4] sm:$0xff]  ;;  %v469_v9 = vld [vmem:[%s1078_s4 + $0x8] sm:$0xff]  ;;  %v865_v10 = vmov 0   ;;  %vm461_vm5 = vcmask 1043456   ;;  %vm480_vm11 = vcmask 293888  }
  0x16   : > { %s315_s11 = scalar_select %p314_p10, %s839_s20, 1  ;;  %800 = vset.pattern.permute.xlu1 %v865_v10  ;;  %799 = vset.pattern.permute.xlu0 %v865_v10 }
  0x17   : > { %s679_s12 = sshll.u32 %s313_s10, 1  ;;  %s1104_s9 = smov (!%p335_p11, %s334_s9), 1  ;;  %v352_v11 = vand.u32 127, %v351_v6 }
  0x18   : > { %s317_s13 = sadd.s32 %s679_s12, %s315_s11  ;;  %p682_p13 = scmp.lt.s32.totalorder %s681_s27, 1 }
  0x19   : > { %s680_s14 = sshll.u32 %s317_s13, 2  ;;  %s1106_s9 = smov (!%p335_p11, %s1104_s9), 1  ;;  %v357_v13 = vand.u32 15, %v352_v11  ;;  %v415_v17 = vadd.s32 15, %v352_v11  ;;  %v430_v20 = vadd.s32 16, %v352_v11  ;;  %v440_v25 = vadd.s32 17, %v352_v11 }
  0x1a   : > { %s319_s17 = scalar_lea.vmem %s1082_s0, %s680_s14  ;;  %s1108_s27 = smov (!%p321_p12, %s681_s27), 0  ;;  %v385_v31 = vadd.s32 4294967280, %v352_v11  ;;  %v367_v33 = vadd.s32 4294967279, %v352_v11  ;;  %v395_v42 = vadd.s32 4294967281, %v352_v11 }
  0x1b   : > { %v966_v0 = vld [vmem:[%s319_s17] sm:$0xf]  ;;  %s342_s30 = sadd.s32 %s679_s12, %s1106_s9  ;;  %s1110_s27 = smov (!%p682_p13, %s1108_s27), 1  ;;  %vm990_vm0 = vcmp.ne.s32.totalorder %v357_v13, 15  ;;  %vm416_vm2 = vcmp.ge.s32.totalorder %v415_v17, 128  ;;  %vm431_vm3 = vcmp.ge.s32.totalorder %v430_v20, 128 }
  0x1c   : > { %438 = vrot.lane.b32.xlu1 %v966_v0, %s857_s28  ;;  %s693_s6 = sshll.u32 %s342_s30, 2  ;;  %s858_s13 = smov 127   ;;  %vm441_vm6 = vcmp.ge.s32.totalorder %v440_v25, 128  ;;  %vm1008_vm7 = vcmp.ne.s32.totalorder %v357_v13, 0  ;;  %vm386_vm8 = vcmp.lt.s32.totalorder %v385_v31, 0  ;;  %vm368_vm9 = vcmp.lt.s32.totalorder %v367_v33, 0 }
  0x1d   : > { %s344_s11 = scalar_lea.vmem %s1076_s2, %s693_s6  ;;  %410 = vrot.lane.b32.xlu2 %v966_v0, %s858_s13  ;;  %s328_s14 = sadd.s32 %s1110_s27, %s679_s12  ;;  %vm396_vm10 = vcmp.lt.s32.totalorder %v395_v42, 0 }
  0x1e   : > { %v350_v1 = vld [vmem:[%s344_s11] sm:$0xf]  ;;  %s859_s15 = smov 112   ;;  %s860_s16 = smov 113  }
  0x1f   : > { %v774_v2 = vpack.i.bf16 %v966_v0, %v350_v1  ;;  %s688_s17 = sshll.u32 %s328_s14, 2  ;;  %s861_s6 = smov 15  }
  0x20   : > { %s330_s30 = scalar_lea.vmem %s1075_s1, %s688_s17  ;;  %s862_s7 = smov 16  }
  0x21   : > { %775 = vrot.lane.b32.xlu0 %v774_v2, %s859_s15  ;;  %v349_v3 = vld [vmem:[%s330_s30] sm:$0xf]  ;;  %s863_s10 = smov 17   ;;  %s864_s12 = smov 1  }
  0x22   : > { %v784_v4 = vpack.i.bf16 %v966_v0, %v349_v3  ;;  %p371_p0 = scmp.gt.s32.totalorder %s839_s20, 0  ;;  %s309_s30 = sand.u32 1, %s831_s18  }
  0x24   : > { %780 = vrot.lane.b32.xlu1 %v774_v2, %s860_s16  ;;  %s372_s14 = scalar_select %p371_p0, 1, 0 }
  0x25   : > { %785 = vrot.lane.b32.xlu2 %v784_v4, %s861_s6  ;;  %s678_s6 = sshll.u32 %s309_s30, 4 }
  0x26   : > { %v373_v24 = vstv %s372_s14 }
  0x27   : > { %vm1004_vm4 = vcmp.eq.s32.totalorder %v373_v24, 1 }
  0x29   : > { %442 = vrot.lane.b32.xlu0 %v350_v1, %s857_s28  ;;  %s420_s28 = scalar_select %p314_p10, 1, 0 }
  0x2b   : > { %v421_v14 = vstv %s420_s28 }
  0x2c   : > { %790 = vrot.lane.b32.xlu1 %v784_v4, %s862_s7  ;;  %vm994_vm1 = vcmp.eq.s32.totalorder %v421_v14, 1  ;;  %s311_s7 = scalar_lea.vmem [#allocation2], %s678_s6 }
  0x2d   : > { %795 = vrot.lane.b32.xlu2 %v784_v4, %s863_s10  ;;  %v466_v4 = vld [vmem:[%s1077_s3] sm:$0xff]  ;;  %s698_s10 = sshll.u32 (%p942_p5), %s843_s21, 2 }
  0x31   : > { %407 = vrot.lane.b32.xlu0 %v966_v0, %s864_s12  ;;  %s525_s12 = sadd.s32 (%p942_p5), %s839_s20, %s698_s10 }
  0x32   : > { %s699_s18 = sshll.u32 (%p942_p5), %s525_s12, 3 }
  0x33   : > { %s527_s11 = scalar_lea.vmem (%p942_p5), %s1079_s5, %s699_s18 }
  0x34   : > { %477 = vperm.xlu1 %800, %v469_v9  }
  0x39   : > { %472 = vperm.xlu0 %799, %v468_v8  }
  0x77   : > { %v411_v5 = vpop.permute.xlu2 %410 }
  0x78   : > { %v412_v29 = vsel %vm990_vm0, %v411_v5, 0.0  ;;  %v467_v5 = vld [vmem:[%s1077_s3 + $0x8] sm:$0xff] }
  0x79   : > { %v456_v37 = vrot.slane %v412_v29, 4 }
  0x7b   : > { %v464_v58 = vsel %vm461_vm5, %v966_v0, %v456_v37 }
  0x7f   : > { %v986_v12 = vpop.permute.xlu2 %785 }
  0x80   : > { %v787_v38 = vunpack.i.l.bf16 %v986_v12  ;;  %v788_v53 = vunpack.i.h.bf16 %v986_v12 }
  0x82   : > { %v399_v54 = vsel %vm1004_vm4, %v787_v38, 0.0 }
  0x83   : > { %v402_v60 = vsel %vm396_vm10, %v399_v54, %v788_v53 }
  0x84   : > { %v406_v2 = vsel %vm990_vm0, %v402_v60, 0.0 }
  0x87   : > { %v796_v28 = vpop.permute.xlu2 %795 }
  0x88   : > { %v797_v36 = vunpack.i.l.bf16 %v796_v28  ;;  %v798_v48 = vunpack.i.h.bf16 %v796_v28 }
  0x8a   : > { %v375_v52 = vsel %vm1004_vm4, %v797_v36, 0.0 }
  0x8b   : > { %v378_v57 = vsel %vm368_vm9, %v375_v52, %v798_v48 }
  0x8c   : > { %v382_v63 = vsel %vm1008_vm7, %v378_v57, 0.0 }
  0x8e   : > { %v439_v7 = vpop.permute.xlu1 %438 }
  0x93   : > { %v776_v15 = vpop.permute.xlu0 %775 }
  0x94   : > { %v777_v18 = vunpack.i.l.bf16 %v776_v15  ;;  %v778_v26 = vunpack.i.h.bf16 %v776_v15 }
  0x96   : > { %v781_v16 = vpop.permute.xlu1 %780  ;;  %v434_v30 = vsel %vm994_vm1, %v777_v18, 0.0 }
  0x97   : > { %v782_v19 = vunpack.i.l.bf16 %v781_v16  ;;  %v783_v23 = vunpack.i.h.bf16 %v781_v16  ;;  %v437_v41 = vsel %vm431_vm3, %v434_v30, %v778_v26 }
  0x98   : > { %v459_v51 = vrot.slane %v437_v41, 4 }
  0x99   : > { %v423_v27 = vsel %vm994_vm1, %v782_v19, 0.0 }
  0x9a   : > { %v426_v35 = vsel %vm416_vm2, %v423_v27, %v783_v23 }
  0x9b   : > { %v443_v39 = vpop.permute.xlu0 %442  ;;  %v427_v47 = vsel %vm1008_vm7, %v426_v35, 0.0 }
  0x9c   : > { %v444_v43 = vsel %vm994_vm1, %v443_v39, 0.0  ;;  %v465_v55 = vsel %vm461_vm5, %v427_v47, %v459_v51 }
  0x9d   : > { %v447_v46 = vsel %vm441_vm6, %v444_v43, %v439_v7 }
  0x9e   : > { %v791_v40 = vpop.permute.xlu1 %790  ;;  %v448_v49 = vsel %vm990_vm0, %v447_v46, 0.0 }
  0x9f   : > { %v793_v44 = vunpack.i.h.bf16 %v791_v40  ;;  %v792_v45 = vunpack.i.l.bf16 %v791_v40  ;;  %694 = vmatpush.msk.msra.mxu0 %vm461_vm5, %v448_v49  ;;  %704 = vmatpush.msk.msra.mxu1 %vm461_vm5, %v448_v49 }
  0xa1   : > { %v389_v50 = vsel %vm1004_vm4, %v792_v45, 0.0  ;;  %502 = vmatpush.msra.mxu0 %v465_v55  ;;  %705 = vmatpush.msra.mxu1 %v465_v55 }
  0xa2   : > { %v392_v56 = vsel %vm386_vm8, %v389_v50, %v793_v44 }
  0xa3   : > { %v408_v59 = vpop.permute.xlu0 %407  ;;  %503 = vmatpush.msra.mxu0 %v464_v58  ;;  %706 = vmatpush.msra.mxu1 %v464_v58  ;;  %v450_v61 = vrot.slane %v392_v56, 4 }
  0xa4   : > { %v409_v62 = vsel %vm1008_vm7, %v408_v59, 0.0 }
  0xa5   : > { %v453_v1 = vrot.slane %v409_v62, 4  ;;  %v462_v0 = vsel %vm461_vm5, %v382_v63, %v450_v61 }
  0xa6   : > { %v478_v7 = vpop.permute.xlu1 %477 }
  0xa7   : > { %v463_v3 = vsel %vm461_vm5, %v406_v2, %v453_v1 }
  0xa8   : > { %504 = vmatpush.msra.mxu0 %v463_v3  ;;  %707 = vmatpush.msra.mxu1 %v463_v3 }
  0xaa   : > { %505 = vmatpush.msra.mxu0 %v462_v0  ;;  %708 = vmatpush.msra.mxu1 %v462_v0 }
  0xab   : > { %695 = vmatmul.msk.f32.vlgmr.msra.gmra.mxu0 %vm480_vm11, %v466_v4  ;;  %696 = vmatmul.msk.f32.vlgmr.msra.gmra.mxu1 %vm480_vm11, %v467_v5  ;;  %v473_v6 = vpop.permute.xlu0 %472 }
 0x128   : > { %v507_v8 = vpop.f32.mrf.mxu0  ;;  %v510_v9 = vpop.f32.mrf.mxu1 }
 0x129   : > { %v508_v10 = vadd.f32 %v507_v8, %v473_v6  ;;  %v511_v11 = vadd.f32 %v510_v9, %v478_v7 }
 0x12a   : > { %523 = sbr.rel (!%p942_p5) target bundleno = 311 (0x137), region = 44 }
 0x12b   : > { %v513_v12 = vmax.f32 %v508_v10, 0.0  ;;  %v514_v13 = vmax.f32 %v511_v11, 0.0 }
 0x12d   : > { %515 = vst [vmem:[%s311_s7] sm:$0xff] %v513_v12 }
 0x12e   : > { %516 = vst [vmem:[%s311_s7 + $0x8] sm:$0xff] %v514_v13 }
 0x134   : > { %v558_v14 = vld [vmem:[%s311_s7] sm:$0xff] }
 0x135   : > { %v560_v15 = vld [vmem:[%s311_s7 + $0x8] sm:$0xff]  ;;  %559 = vst [vmem:[%s527_s11] sm:$0xff] %v558_v14 }
 0x136   : > { %561 = vst [vmem:[%s527_s11 + $0x10] sm:$0xff] %v560_v15 }
 0x137 PF: > { %s15_s24 = sadd.s32 1, %s855_s24   ;;  %s1091_s18 = smov %s835_s19 }
 0x138   : > { %p12_p1 = scmp.ge.s32.totalorder %s15_s24, 6   ;;  %s1092_s19 = smov %s953_s8 }
 0x139   : > { %s1093_s20 = smov %s847_s22  ;;  %s1094_s21 = smov %s851_s23 }
 0x13a   : > { %s1095_s22 = smov %s1098_s25  ;;  %s1096_s23 = smov %s1102_s26 }
 0x13b   :  { %14 = sbr.rel (!%p12_p1) target bundleno = 6 (0x6), region = 114 }

</bundles_post_ra>
